<compile_context>
chip_gen: v7x
topology: tpu7x:2x2x1
jax: 0.10.0
libtpu: 0.0.40
codegen_flags: <defaults>
</compile_context>

<pallas_src>
import math

import jax
import jax.numpy as jnp
from jax.experimental import pallas as pl
from jax.experimental.pallas import tpu as pltpu

_LANES = 128
_SUBLANE_MULT = 16              # multiple of 8 (f32) and 16 (bf16) sublane tiling
_TARGET_BLOCK_BYTES = 2 << 20   # ~2 MiB per input per grid step
_LOG2 = math.log(2.0)


def _round_up(x: int, m: int) -> int:
    return ((x + m - 1) // m) * m


def _cdiv(a: int, b: int) -> int:
    return -(-a // b)


def _num_tensorcores() -> int:
    # Only split the grid across cores on multi-TensorCore chips (v7x).
    # v5e / v6e have a single TensorCore, where the extra axis only serializes.
    # NOTE: on v7x, confirm via xprof that the "parallel" leading axis actually
    # engages both TensorCores; if not, switch to an explicit core split.
    try:
        kind = jax.devices()[0].device_kind.lower()
    except Exception:
        return 1
    return 2 if ("v7" in kind or "7x" in kind) else 1


def _make_kernel(rows_valid: int, block_rows: int, blocks_per_core: int,
                 need_mask: bool):
    groups = block_rows // 8

    def kernel(yp_ref, yt_ref, out_ref, acc_ref):
        c = pl.program_id(0)   # core split (parallel, size 1 on v5e/v6e)
        i = pl.program_id(1)   # block index within this core (arbitrary)

        @pl.when(i == 0)
        def _init():
            acc_ref[...] = jnp.zeros_like(acc_ref)

        x = yp_ref[...].astype(jnp.float32) - yt_ref[...].astype(jnp.float32)
        # log(cosh(x)) = |x| + log1p(exp(-2|x|)) - log(2)   (numerically stable)
        a = jnp.abs(x)
        lc = a + jnp.log1p(jnp.exp(-2.0 * a)) - _LOG2

        def accumulate(vals):
            # VPU tree-reduce of the block down to one (8, 128) vreg, then a
            # single small accumulator read-modify-write per grid step.
            acc_ref[...] += vals.reshape(groups, 8, _LANES).sum(axis=0)

        if need_mask:
            blk = c * blocks_per_core + i
            row_start = blk * block_rows
            fully_inside = row_start + block_rows <= rows_valid

            @pl.when(fully_inside)
            def _full():
                accumulate(lc)

            @pl.when(jnp.logical_not(fully_inside))
            def _edge():
                # Only whole rows need masking (the sub-128 tail is handled in
                # the wrapper): one sublane-axis iota + compare.
                row = jax.lax.broadcasted_iota(jnp.int32, (block_rows, _LANES), 0)
                accumulate(jnp.where(row_start + row < rows_valid, lc, 0.0))
        else:
            accumulate(lc)

        @pl.when(i == pl.num_programs(1) - 1)
        def _finalize():
            # Single cross-lane reduce + scalar SMEM store, once per core.
            out_ref[0, 0] = jnp.sum(acc_ref[...])

    return kernel


def _stream_view(a: jax.Array) -> jax.Array:
    """Flatten; keep bf16/f32 in their native dtype (upcast happens in-vreg)."""
    a = a.reshape(-1)
    if a.dtype in (jnp.bfloat16, jnp.float32):
        return a
    return a.astype(jnp.float32)


def log_cosh_loss(y_pred: jax.Array, y_true: jax.Array) -> jax.Array:
    assert y_pred.shape == y_true.shape, "shapes must match (no broadcasting used)"
    n = int(y_pred.size)

    yp = _stream_view(y_pred)
    yt = _stream_view(y_true)

    rows_valid = n // _LANES
    n_main = rows_valid * _LANES

    # Ragged tail (< 128 elements): plain JAX, negligible cost, no pad copies.
    tail_sum = jnp.float32(0.0)
    if n_main != n:
        xt = yp[n_main:].astype(jnp.float32) - yt[n_main:].astype(jnp.float32)
        at = jnp.abs(xt)
        tail_sum = jnp.sum(at + jnp.log1p(jnp.exp(-2.0 * at)) - _LOG2)

    if rows_valid == 0:
        return tail_sum / jnp.float32(n)

    if n_main != n:
        yp_main = yp[:n_main]
        yt_main = yt[:n_main]
    else:
        yp_main, yt_main = yp, yt
    yp_main = yp_main.reshape(rows_valid, _LANES)
    yt_main = yt_main.reshape(rows_valid, _LANES)

    # ~2 MiB per input per grid step, scaled by the streamed dtype.
    itemsize = max(yp_main.dtype.itemsize, yt_main.dtype.itemsize)
    max_block_rows = max(_SUBLANE_MULT, _TARGET_BLOCK_BYTES // (_LANES * itemsize))
    block_rows = min(max_block_rows, _round_up(rows_valid, _SUBLANE_MULT))

    total_blocks = _cdiv(rows_valid, block_rows)
    ncores = _num_tensorcores()
    if total_blocks < ncores:
        ncores = 1
    blocks_per_core = _cdiv(total_blocks, ncores)
    covered_rows = ncores * blocks_per_core * block_rows
    need_mask = covered_rows != rows_valid

    if ncores * blocks_per_core == total_blocks:
        def idx_map(c, i, _bpc=blocks_per_core):
            return (c * _bpc + i, 0)
    else:
        # Odd block count: overhanging (core, step) pairs are clamped to the
        # last valid block; their contribution is fully masked in-kernel.
        def idx_map(c, i, _bpc=blocks_per_core, _last=total_blocks - 1):
            return (jnp.minimum(c * _bpc + i, _last), 0)

    kernel = _make_kernel(rows_valid, block_rows, blocks_per_core, need_mask)

    partial_sums = pl.pallas_call(
        kernel,
        out_shape=jax.ShapeDtypeStruct((ncores, 1), jnp.float32),
        grid_spec=pltpu.PrefetchScalarGridSpec(
            num_scalar_prefetch=0,
            grid=(ncores, blocks_per_core),
            in_specs=[
                pl.BlockSpec((block_rows, _LANES), idx_map),
                pl.BlockSpec((block_rows, _LANES), idx_map),
            ],
            out_specs=pl.BlockSpec(
                (1, 1), lambda c, i: (c, 0), memory_space=pltpu.SMEM
            ),
            scratch_shapes=[pltpu.VMEM((8, _LANES), jnp.float32)],
        ),
        compiler_params=pltpu.CompilerParams(
            dimension_semantics=("parallel", "arbitrary"),
        ),
    )(yp_main, yt_main)

    # Per-core partials + tail -> mean (cheap XLA ops outside the kernel).
    return (jnp.sum(partial_sums) + tail_sum) / jnp.float32(n)


class LogCoshLoss:
    """JAX/Pallas equivalent of the PyTorch LogCoshLoss module (no parameters)."""

    def __call__(self, y_pred: jax.Array, y_true: jax.Array) -> jax.Array:
        return log_cosh_loss(y_pred, y_true)


if __name__ == "__main__":
    key = jax.random.PRNGKey(0)
    k1, k2, k3, k4 = jax.random.split(key, 4)

    loss_fn = LogCoshLoss()

    def ref_loss(yp, yt):
        x = yp.astype(jnp.float32) - yt.astype(jnp.float32)
        return jnp.mean(x + jax.nn.softplus(-2.0 * x) - math.log(2.0))

    # Lane-aligned case (n % 128 == 0): small NCHW-like shape.
    y_pred = jax.random.normal(k1, (2, 4, 16, 16), dtype=jnp.float32)
    y_true = jax.random.normal(k2, (2, 4, 16, 16), dtype=jnp.float32)
    loss = jax.block_until_ready(loss_fn(y_pred, y_true))
    ref = ref_loss(y_pred, y_true)
    assert jnp.allclose(loss, ref, rtol=1e-5, atol=1e-6), (loss, ref)

    # Ragged case (n % 128 != 0): exercises the in-kernel row mask + jnp tail.
    y_pred_r = jax.random.normal(k3, (3, 5, 129), dtype=jnp.float32)
    y_true_r = jax.random.normal(k4, (3, 5, 129), dtype=jnp.float32)
    loss_r = jax.block_until_ready(loss_fn(y_pred_r, y_true_r))
    ref_r = ref_loss(y_pred_r, y_true_r)
    assert jnp.allclose(loss_r, ref_r, rtol=1e-5, atol=1e-6), (loss_r, ref_r)

    print("KERNEL_OK")
</pallas_src>

<mosaic_0001>
module attributes {stable_mosaic.version = 11 : i64} {
  func.func @kernel(%arg0: i32, %arg1: i32, %arg2: memref<16x128xf32, #tpu.memory_space<vmem>>, %arg3: memref<16x128xf32, #tpu.memory_space<vmem>>, %arg4: memref<1x1xf32, #tpu.memory_space<smem>>, %arg5: memref<8x128xf32, #tpu.memory_space<vmem>>) attributes {dimension_semantics = [#tpu.dimension_semantics<parallel>, #tpu.dimension_semantics<arbitrary>], iteration_bounds = array<i64: 1, 1>, scalar_prefetch = 0 : i64, scratch_operands = 1 : i64, tpu.core_type = #tpu.core_type<tc>, window_params = [{transform_indices = @transform_0, window_bounds = array<i64: 16, 128>}, {transform_indices = @transform_1, window_bounds = array<i64: 16, 128>}, {transform_indices = @transform_2, window_bounds = array<i64: 1, 1>}]} {
    %c0_i32 = arith.constant 0 : i32
    %0 = arith.cmpi eq, %arg1, %c0_i32 : i32
    %1 = arith.extui %0 : i1 to i32
    %c0_i32_0 = arith.constant 0 : i32
    %2 = arith.cmpi ne, %1, %c0_i32_0 : i32
    scf.if %2 {
      %cst_12 = arith.constant 0.000000e+00 : f32
      %22 = vector.broadcast %cst_12 : f32 to vector<8x128xf32>
      %c0_13 = arith.constant 0 : index
      %c0_14 = arith.constant 0 : index
      %23 = vector.load %arg5[%c0_13, %c0_14] : memref<8x128xf32, #tpu.memory_space<vmem>>, vector<8x128xf32>
      tpu.vector_store %arg5[%c0_13, %c0_14], %22 {strides = array<i32>} : memref<8x128xf32, #tpu.memory_space<vmem>>, vector<8x128xf32>,
    } else {
    }
    %c0 = arith.constant 0 : index
    %c0_1 = arith.constant 0 : index
    %3 = vector.load %arg2[%c0, %c0_1] : memref<16x128xf32, #tpu.memory_space<vmem>>, vector<16x128xf32>
    %c0_2 = arith.constant 0 : index
    %c0_3 = arith.constant 0 : index
    %4 = vector.load %arg3[%c0_2, %c0_3] : memref<16x128xf32, #tpu.memory_space<vmem>>, vector<16x128xf32>
    %5 = arith.subf %3, %4 : vector<16x128xf32>
    %6 = math.absf %5 : vector<16x128xf32>
    %cst = arith.constant -2.000000e+00 : f32
    %7 = vector.broadcast %cst : f32 to vector<16x128xf32>
    %8 = arith.mulf %7, %6 : vector<16x128xf32>
    %9 = math.exp %8 : vector<16x128xf32>
    %10 = math.log1p %9 : vector<16x128xf32>
    %11 = arith.addf %6, %10 : vector<16x128xf32>
    %cst_4 = arith.constant 0.693147182 : f32
    %12 = vector.broadcast %cst_4 : f32 to vector<16x128xf32>
    %13 = arith.subf %11, %12 : vector<16x128xf32>
    %c0_5 = arith.constant 0 : index
    %c0_6 = arith.constant 0 : index
    %14 = vector.load %arg5[%c0_5, %c0_6] : memref<8x128xf32, #tpu.memory_space<vmem>>, vector<8x128xf32>
    %15 = vector.shape_cast %13 : vector<16x128xf32> to vector<2x8x128xf32>
    %cst_7 = arith.constant dense<0.000000e+00> : vector<8x128xf32>
    %16 = vector.multi_reduction <add>, %15, %cst_7 [0] : vector<2x8x128xf32> to vector<8x128xf32>
    %17 = arith.addf %14, %16 : vector<8x128xf32>
    %c0_8 = arith.constant 0 : index
    %c0_9 = arith.constant 0 : index
    %18 = vector.load %arg5[%c0_8, %c0_9] : memref<8x128xf32, #tpu.memory_space<vmem>>, vector<8x128xf32>
    tpu.vector_store %arg5[%c0_8, %c0_9], %17 {strides = array<i32>} : memref<8x128xf32, #tpu.memory_space<vmem>>, vector<8x128xf32>,
    %c0_i32_10 = arith.constant 0 : i32
    %19 = arith.cmpi eq, %arg1, %c0_i32_10 : i32
    %20 = arith.extui %19 : i1 to i32
    %c0_i32_11 = arith.constant 0 : i32
    %21 = arith.cmpi ne, %20, %c0_i32_11 : i32
    scf.if %21 {
      %c0_12 = arith.constant 0 : index
      %c0_13 = arith.constant 0 : index
      %22 = vector.load %arg5[%c0_12, %c0_13] : memref<8x128xf32, #tpu.memory_space<vmem>>, vector<8x128xf32>
      %23 = vector.shape_cast %22 : vector<8x128xf32> to vector<1x8x128xf32>
      %cst_14 = arith.constant dense<0.000000e+00> : vector<1xf32>
      %24 = vector.multi_reduction <add>, %23, %cst_14 [1, 2] : vector<1x8x128xf32> to vector<1xf32>
      %25 = vector.shape_cast %24 : vector<1xf32> to vector<1x1x1xf32>
      %26 = vector.extract %25[0, 0, 0] : f32 from vector<1x1x1xf32>
      %c0_15 = arith.constant 0 : index
      %c0_16 = arith.constant 0 : index
      %27 = memref.load %arg4[%c0_15, %c0_16] : memref<1x1xf32, #tpu.memory_space<smem>>
      memref.store %26, %arg4[%c0_15, %c0_16] : memref<1x1xf32, #tpu.memory_space<smem>>
    } else {
    }
    return
  }
  func.func @transform_0(%arg0: i32, %arg1: i32) -> (i32, i32) {
    %c1_i32 = arith.constant 1 : i32
    %0 = arith.muli %arg0, %c1_i32 : i32
    %1 = arith.addi %0, %arg1 : i32
    %c0_i32 = arith.constant 0 : i32
    %c0_i32_0 = arith.constant 0 : i32
    return %1, %c0_i32 : i32, i32
  }
  func.func @transform_1(%arg0: i32, %arg1: i32) -> (i32, i32) {
    %c1_i32 = arith.constant 1 : i32
    %0 = arith.muli %arg0, %c1_i32 : i32
    %1 = arith.addi %0, %arg1 : i32
    %c0_i32 = arith.constant 0 : i32
    %c0_i32_0 = arith.constant 0 : i32
    return %1, %c0_i32 : i32, i32
  }
  func.func @transform_2(%arg0: i32, %arg1: i32) -> (i32, i32) {
    %c0_i32 = arith.constant 0 : i32
    %c0_i32_0 = arith.constant 0 : i32
    return %arg0, %c0_i32 : i32, i32
  }
}

</mosaic_0001>

<bundles_post_ra>
// kernel: tpu_custom_call.1
= control target key start
LH: loop header
LB: loop body
LE: loop exit
PB: predicated region body
PF: predicated region fallthrough
CT: control target
= control target key end

     0   :  { %7 = vsyncpa [#allocation4], 0  ;;  %s260_s0 = inlined_call_operand.hbm [shape: f32[16,128], index: 0, kind: input, shape index: {}]   ;;  %s261_s1 = inlined_call_operand.hbm [shape: f32[16,128], index: 1, kind: input, shape index: {}]   ;;  %s262_s2 = inlined_call_operand.hbm [shape: f32[1,1], index: 2, kind: output, shape index: {}]  }
   0x1   :  { %8 = vsyncpa [#allocation7], 0 }
   0x2   :  { %9 = vsyncpa [#allocation5], 0  ;;  %s204_s9 = smov [#allocation3]   ;;  %s144_s13 = scalar_lea.hbm %s260_s0, 256 }
   0x3   :  { %s19_s10 = sshll.u32 %s204_s9, 4  ;;  %p145_p0 = scmp.ne.s32.totalorder %s260_s0, %s144_s13  ;;  %s20_s10 = int_to_ptr.vmem [resolvable:$true] %s19_s10 }
   0x4   :  { %p148_p1 = scmp.lt.u32.totalorder %s144_s13, %s260_s0 }
   0x6   :  { %p150_p2 = pnand %p148_p1, %p145_p0 }
   0x8   :  { %153 = shalt.err (!%p150_p2)
}
   0x9   :  { %s154_s18 = scalar_lea.vmem %s20_s10, 256  ;;  %p159_p4 = scmp.lt.s32.totalorder %s20_s10, %s20_s10 }
   0xa   :  { %p155_p3 = scmp.ne.s32.totalorder %s20_s10, %s154_s18  ;;  %p160_p5 = scmp.lt.s32.totalorder %s154_s18, %s154_s18 }
   0xc   :  { %p161_p6 = por %p160_p5, %p159_p4 }
   0xe   :  { %p162_p7 = pnand %p161_p6, %p155_p3 }
  0x10   :  { %165 = shalt.err (!%p162_p7)
}
  0x11   :  { %s205_s19 = smov 128   ;;  %s206_s20 = smov 8  }
  0x12   :  { %25 = dma.hbm_to_vmem [thread:$0]  %s260_s0, 256, %s20_s10, [#allocation4], %s205_s19, %s205_s19, %s206_s20  }
  0x13   :  { %s207_s23 = smov [#allocation6]   ;;  %s166_s27 = scalar_lea.hbm %s261_s1, 256 }
  0x14   :  { %s35_s24 = sshll.u32 %s207_s23, 4  ;;  %p167_p8 = scmp.ne.s32.totalorder %s261_s1, %s166_s27  ;;  %s36_s24 = int_to_ptr.vmem [resolvable:$true] %s35_s24 }
  0x15   :  { %p170_p9 = scmp.lt.u32.totalorder %s166_s27, %s261_s1 }
  0x17   :  { %p172_p10 = pnand %p170_p9, %p167_p8 }
  0x19   :  { %175 = shalt.err (!%p172_p10)
}
  0x1a   :  { %s176_s4 = scalar_lea.vmem %s36_s24, 256  ;;  %p181_p12 = scmp.lt.s32.totalorder %s36_s24, %s36_s24 }
  0x1b   :  { %p177_p11 = scmp.ne.s32.totalorder %s36_s24, %s176_s4  ;;  %p182_p13 = scmp.lt.s32.totalorder %s176_s4, %s176_s4 }
  0x1d   :  { %p183_p0 = por %p182_p13, %p181_p12 }
  0x1f   :  { %p184_p1 = pnand %p183_p0, %p177_p11 }
  0x21   :  { %187 = shalt.err (!%p184_p1)
}
  0x22   :  { %41 = dma.hbm_to_vmem [thread:$0]  %s261_s1, 256, %s36_s24, [#allocation7], %s205_s19, %s205_s19, %s206_s20  }
  0x23   :  { %198 = dma.done.wait [#allocation4], 256  }
  0x24   :  { %199 = vsyncadd [#allocation4], 4294967040 }
  0x25   :  { %200 = dma.done.wait [#allocation7], 256  }
  0x26   :  { %201 = vsyncadd [#allocation7], 4294967040  ;;  %v57_v0 = vld [vmem:[#allocation3] sm:$0xff]  ;;  %v58_v1 = vld [vmem:[#allocation3 + $0x8] sm:$0xff]  ;;  %s188_s8 = scalar_lea.hbm %s262_s2, 16 }
  0x27   :  { %v59_v2 = vld [vmem:[#allocation6] sm:$0xff]  ;;  %v60_v3 = vld [vmem:[#allocation6 + $0x8] sm:$0xff]  ;;  %p189_p2 = scmp.ne.s32.totalorder %s262_s2, %s188_s8  ;;  %p192_p3 = scmp.lt.u32.totalorder %s188_s8, %s262_s2 }
  0x28   :  { %v61_v4 = vsub.f32 %v57_v0, %v59_v2  ;;  %v62_v5 = vsub.f32 %v58_v1, %v60_v3 }
  0x29   :  { %p194_p4 = pnand %p192_p3, %p189_p2 }
  0x2a   :  { %v63_v6 = vand.u32 2147483647, %v61_v4  ;;  %v64_v7 = vand.u32 2147483647, %v62_v5 }
  0x2c   :  { %v65_v8 = vmul.f32 -2.0, %v63_v6  ;;  %v66_v9 = vmul.f32 -2.0, %v64_v7 }
  0x2e   :  { %v67_v10 = vmul.f32 1.442695, %v65_v8  ;;  %v69_v11 = vmul.f32 1.442695, %v66_v9 }
  0x30   :  { %136 = vpow2.f32 %v67_v10 }
  0x31   :  { %138 = vpow2.f32 %v69_v11 }
  0x3a   :  { %v137_v12 = vpop.eup %136 }
  0x3b   :  { %v139_v13 = vpop.eup %138  ;;  %v71_v14 = vadd.f32 1.0, %v137_v12  ;;  %v74_v16 = vmul.f32 -0.5, %v137_v12  ;;  %v77_v19 = vand.u32 2147483647, %v137_v12 }
  0x3c   :  { %v80_v15 = vadd.f32 1.0, %v139_v13  ;;  %v83_v17 = vmul.f32 -0.5, %v139_v13  ;;  %v86_v21 = vand.u32 2147483647, %v139_v13 }
  0x3d   :  { %140 = vlog2.f32 %v71_v14  ;;  %v75_v18 = vadd.f32 1.0, %v74_v16  ;;  %vm78_vm0 = vcmp.lt.f32.partialorder %v77_v19, 0.0004427343 }
  0x3e   :  { %142 = vlog2.f32 %v80_v15  ;;  %v84_v20 = vadd.f32 1.0, %v83_v17  ;;  %vm87_vm1 = vcmp.lt.f32.partialorder %v86_v21, 0.0004427343 }
  0x3f   :  { %v76_v22 = vmul.f32 %v137_v12, %v75_v18 }
  0x40   :  { %v85_v24 = vmul.f32 %v139_v13, %v84_v20 }
  0x47   :  { %v141_v23 = vpop.eup %140 }
  0x48   :  { %v143_v25 = vpop.eup %142  ;;  %v73_v26 = vmul.f32 0.6931472, %v141_v23 }
  0x49   :  { %v82_v27 = vmul.f32 0.6931472, %v143_v25 }
  0x4a   :  { %v79_v28 = vsel %vm78_vm0, %v76_v22, %v73_v26 }
  0x4b   :  { %v88_v29 = vsel %vm87_vm1, %v85_v24, %v82_v27  ;;  %v89_v30 = vadd.f32 %v79_v28, %v63_v6 }
  0x4c   :  { %v90_v31 = vadd.f32 %v88_v29, %v64_v7 }
  0x4d   :  { %v127_v32 = vadd.f32 -0.6931472, %v89_v30 }
  0x4e   :  { %v128_v33 = vadd.f32 -0.6931472, %v90_v31 }
  0x50   :  { %v94_v34 = vadd.f32 %v128_v33, %v127_v32 }
  0x52   :  { %101 = vadd.xlane.f32.xlu0 %v94_v34 }
  0xdf   :  { %v102_v35 = vpop.xlane.xlu0 %101 }
  0xe0   :  { %v103_v36 = vrot.slane %v102_v35, 4 }
  0xe2   :  { %v104_v37 = vadd.f32 %v103_v36, %v102_v35 }
  0xe4   :  { %v105_v38 = vrot.slane %v104_v37, 2 }
  0xe6   :  { %v106_v39 = vadd.f32 %v105_v38, %v104_v37 }
  0xe8   :  { %v107_v40 = vrot.slane %v106_v39, 1 }
  0xea   :  { %v108_v41 = vadd.f32 %v107_v40, %v106_v39 }
  0xec   :  { %129 = vpush %v108_v41 }
 0x11d   :  { %s130_s1 = spop %129 }
 0x11e   :  { %111 = sst [smem:[#allocation8]] %s130_s1 }
 0x11f   :  { %197 = shalt.err (!%p194_p4)
}
 0x120   :  { %s208_s13 = smov [#allocation8]  }
 0x121   :  { %119 = dma.smem_to_hbm %s208_s13, 16, %s262_s2, [#allocation5]  }
 0x122   :  { %202 = dma.done.wait [#allocation5], 16  }
 0x123   :  { %203 = vsyncadd [#allocation5], 4294967280 }
 0x124   :  { %123 = sfence }
 0x125   :  { %124 = vsyncpa [#allocation4], 1 }
 0x126   :  { %125 = vsyncpa [#allocation7], 1 }
 0x127   :  { %126 = vsyncpa [#allocation5], 1 }

</bundles_post_ra>
